<compile_context>
chip_gen: v6e
topology: v6e:2x2x1
jax: 0.10.0
libtpu: 0.0.40
codegen_flags: <defaults>
</compile_context>

<pallas_src>
import functools
import math

import jax
import jax.numpy as jnp
import numpy as np
from jax.experimental import pallas as pl
from jax.experimental.pallas import tpu as pltpu


@functools.lru_cache(maxsize=None)
def _interp_matrix_np(in_size: int, out_size: int) -> np.ndarray:
    """(out_size, in_size) 1-D linear interpolation matrix, align_corners=True.

    Built on host with numpy and lru_cached per (in_size, out_size) so repeated
    calls pay zero coefficient-construction cost (perf review: the eager
    device-side eye-gather einsum likely exceeded the kernel's wall time).
    """
    if out_size == 1 or in_size == 1:
        src = np.zeros((out_size,), np.float32)
    else:
        src = np.arange(out_size, dtype=np.float32) * ((in_size - 1) / (out_size - 1))
    i0 = np.clip(np.floor(src).astype(np.int64), 0, in_size - 1)
    i1 = np.minimum(i0 + 1, in_size - 1)
    frac = (src - i0).astype(np.float32)
    m = np.zeros((out_size, in_size), np.float32)
    rows = np.arange(out_size)
    np.add.at(m, (rows, i0), 1.0 - frac)
    np.add.at(m, (rows, i1), frac)
    return m


@functools.lru_cache(maxsize=None)
def _coeff_mats(hi: int, wi: int, ho: int, wo: int):
    """Cached device-resident separable coefficients.

    hmat   : (Ho, Hi)  row-interpolation matrix
    wmat_t : (Wi, Wo)  column-interpolation matrix, pre-transposed for the W-pass
    Total coefficient bytes are O(Hi*Ho + Wi*Wo) (~2 KiB at the test shape)
    instead of the O(Hi*Wi*Ho*Wo) kron matrix of the previous version.
    """
    hmat = jnp.asarray(_interp_matrix_np(hi, ho))
    wmat_t = jnp.asarray(_interp_matrix_np(wi, wo).T)
    # NOTE: casting x / coefficients to bf16 would halve DMA and give v5e's
    # bf16-native MXU 3-6x throughput, but costs ~1e-3 accuracy vs PyTorch;
    # kept f32 so results match the reference to ~1e-6.
    return hmat, wmat_t


def _up_bilinear_kernel(x_ref, wt_ref, h_ref, o_ref):
    # x_ref : (TB, Hi, Wi)  batch-tile of the input (TB = tile of N*C)
    # wt_ref: (Wi, Wo)      W-pass interpolation matrix (transposed)
    # h_ref : (Ho, Hi)      H-pass interpolation matrix
    # o_ref : (TB, Ho, Wo)  batch-tile of the output
    tb, hi, wi = x_ref.shape
    ho = h_ref.shape[0]
    wo = wt_ref.shape[1]

    # --- W-pass: fold (TB, Hi) into the MXU M dimension (layout-preserving
    # reshape since Hi is a multiple of the 8-row sublane tile at these sizes).
    x2 = x_ref[...].reshape(tb * hi, wi)                              # (TB*Hi, Wi)
    t = jnp.dot(x2, wt_ref[...], preferred_element_type=jnp.float32)  # (TB*Hi, Wo)
    t = t.reshape(tb, hi, wo)                                         # (TB, Hi, Wo)

    # --- H-pass: per-image (Ho, Hi) @ (Hi, Wo), expressed as a batched matmul
    # (same pattern as flash attention's 'bqk,bkd->bqd') to avoid any in-kernel
    # transpose of the result.
    hb = jnp.broadcast_to(h_ref[...][None], (tb, ho, hi))             # (TB, Ho, Hi)
    out = jnp.einsum("boh,bhw->bow", hb, t,
                     preferred_element_type=jnp.float32)              # (TB, Ho, Wo)

    o_ref[...] = out.astype(o_ref.dtype)


def up_forward(x_nchw, scale_factor):
    """Forward of Up: bilinear upsample, align_corners=True, NCHW in/out."""
    N, C, Hi, Wi = x_nchw.shape
    Ho = int(math.floor(Hi * scale_factor))
    Wo = int(math.floor(Wi * scale_factor))
    hmat, wmat_t = _coeff_mats(Hi, Wi, Ho, Wo)

    B = N * C
    x = x_nchw.reshape(B, Hi, Wi)   # no padding: block dims equal full spatial dims

    # Batch-tile selection.  The W-pass matmul has M = TB*Hi rows; keep the
    # per-step VMEM footprint (input + intermediate + output, double-buffered)
    # well under the smallest scoped budget (v5e ~16 MiB; v7x physical 64 MiB),
    # cap M rows, and only create multiple grid steps when each step keeps
    # >=256 MXU rows (so v7x's two TCs both get real work; on v5e/v6e extra
    # steps are just serial per-step overhead).  At the toy test shape this
    # resolves to TB = B = 8 and a single grid step.
    vmem_budget = 8 << 20
    per_row_bytes = (Hi * Wi + Hi * Wo + Ho * Wo) * 4 * 2
    max_tb = max(1, min(4096 // max(Hi, 1), vmem_budget // max(per_row_bytes, 1)))
    tb = 1
    for d in range(1, B + 1):
        if B % d == 0 and d <= max_tb:
            tb = d
    if B // tb == 1 and tb % 2 == 0 and (tb // 2) * Hi >= 256:
        tb //= 2   # split across TCs only when each half still has real work
    grid_b = B // tb

    out = pl.pallas_call(
        _up_bilinear_kernel,
        out_shape=jax.ShapeDtypeStruct((B, Ho, Wo), x_nchw.dtype),
        grid_spec=pl.GridSpec(
            grid=(grid_b,),
            in_specs=[
                pl.BlockSpec((tb, Hi, Wi), lambda b: (b, 0, 0)),
                pl.BlockSpec((Wi, Wo), lambda b: (0, 0)),   # tiny, constant block
                pl.BlockSpec((Ho, Hi), lambda b: (0, 0)),   # tiny, constant block
            ],
            out_specs=pl.BlockSpec((tb, Ho, Wo), lambda b: (b, 0, 0)),
        ),
        compiler_params=pltpu.CompilerParams(
            dimension_semantics=("parallel",),
        ),
    )(x, wmat_t, hmat)

    # Leading-dim-only reshape: no extra HBM copy (review item on padded slices).
    return out.reshape(N, C, Ho, Wo)


def _ref_upsample_bilinear_ac(x, scale_factor):
    """Independent plain-JAX reference (gather + elementwise), align_corners=True."""
    N, C, Hi, Wi = x.shape
    Ho = int(math.floor(Hi * scale_factor))
    Wo = int(math.floor(Wi * scale_factor))
    if Ho == 1 or Hi == 1:
        hs = jnp.zeros((Ho,), jnp.float32)
    else:
        hs = jnp.arange(Ho, dtype=jnp.float32) * ((Hi - 1) / (Ho - 1))
    if Wo == 1 or Wi == 1:
        ws = jnp.zeros((Wo,), jnp.float32)
    else:
        ws = jnp.arange(Wo, dtype=jnp.float32) * ((Wi - 1) / (Wo - 1))
    h0 = jnp.clip(jnp.floor(hs).astype(jnp.int32), 0, Hi - 1)
    h1 = jnp.minimum(h0 + 1, Hi - 1)
    fh = (hs - h0.astype(jnp.float32))[None, None, :, None]
    w0 = jnp.clip(jnp.floor(ws).astype(jnp.int32), 0, Wi - 1)
    w1 = jnp.minimum(w0 + 1, Wi - 1)
    fw = (ws - w0.astype(jnp.float32))[None, None, None, :]
    xh0, xh1 = x[:, :, h0, :], x[:, :, h1, :]
    x00, x01 = xh0[:, :, :, w0], xh0[:, :, :, w1]
    x10, x11 = xh1[:, :, :, w0], xh1[:, :, :, w1]
    top = x00 * (1.0 - fw) + x01 * fw
    bot = x10 * (1.0 - fw) + x11 * fw
    return top * (1.0 - fh) + bot * fh


if __name__ == "__main__":
    # Up(scale_factor=2, bilinear=True) on a (2, 4, 16, 16) input.
    N, C, H, W = 2, 4, 16, 16
    scale = 2

    key = jax.random.PRNGKey(0)
    x = jax.random.normal(key, (N, C, H, W), dtype=jnp.float32)

    out = up_forward(x, scale)
    out = jax.block_until_ready(out)

    ref = _ref_upsample_bilinear_ac(x, scale)
    assert out.shape == (N, C, H * scale, W * scale), out.shape
    max_err = float(jnp.max(jnp.abs(out - ref)))
    assert jnp.allclose(out, ref, atol=1e-4, rtol=1e-4), max_err

    print("KERNEL_OK")
</pallas_src>

<mosaic_0001>
module attributes {stable_mosaic.version = 11 : i64} {
  func.func @_up_bilinear_kernel(%arg0: i32, %arg1: memref<8x16x16xf32, #tpu.memory_space<vmem>>, %arg2: memref<16x32xf32, #tpu.memory_space<vmem>>, %arg3: memref<32x16xf32, #tpu.memory_space<vmem>>, %arg4: memref<8x32x32xf32, #tpu.memory_space<vmem>>) attributes {dimension_semantics = [#tpu.dimension_semantics<parallel>], iteration_bounds = array<i64: 1>, scalar_prefetch = 0 : i64, scratch_operands = 0 : i64, tpu.core_type = #tpu.core_type<tc>, window_params = [{transform_indices = @transform_0, window_bounds = array<i64: 8, 16, 16>}, {pipeline_mode = #tpu.pipeline_mode<synchronous>, transform_indices = @transform_1, window_bounds = array<i64: 16, 32>}, {pipeline_mode = #tpu.pipeline_mode<synchronous>, transform_indices = @transform_2, window_bounds = array<i64: 32, 16>}, {transform_indices = @transform_3, window_bounds = array<i64: 8, 32, 32>}]} {
    %c0 = arith.constant 0 : index
    %c0_0 = arith.constant 0 : index
    %c0_1 = arith.constant 0 : index
    %0 = vector.load %arg1[%c0, %c0_0, %c0_1] : memref<8x16x16xf32, #tpu.memory_space<vmem>>, vector<8x16x16xf32>
    %1 = vector.shape_cast %0 : vector<8x16x16xf32> to vector<128x16xf32>
    %c0_2 = arith.constant 0 : index
    %c0_3 = arith.constant 0 : index
    %2 = vector.load %arg2[%c0_2, %c0_3] : memref<16x32xf32, #tpu.memory_space<vmem>>, vector<16x32xf32>
    %cst = arith.constant dense<0.000000e+00> : vector<128x32xf32>
    %3 = tpu.matmul %1, %2, %cst {dimension_numbers = #tpu.dot_dimension_numbers<[1], [0], [0], [1], [0, 0, 1, 1], [], []>} : vector<128x16xf32>, vector<16x32xf32>, vector<128x32xf32> -> vector<128x32xf32>
    %4 = vector.shape_cast %3 : vector<128x32xf32> to vector<8x16x32xf32>
    %c0_4 = arith.constant 0 : index
    %c0_5 = arith.constant 0 : index
    %5 = vector.load %arg3[%c0_4, %c0_5] : memref<32x16xf32, #tpu.memory_space<vmem>>, vector<32x16xf32>
    %6 = vector.shape_cast %5 : vector<32x16xf32> to vector<1x32x16xf32>
    %7 = vector.shape_cast %6 : vector<1x32x16xf32> to vector<1x32x16xf32>
    %8 = vector.broadcast %7 : vector<1x32x16xf32> to vector<8x32x16xf32>
    "tpu.trace_start"() <{level = 10 : i32, message = "boh,bhw->bow"}> : () -> ()
    %cst_6 = arith.constant dense<0.000000e+00> : vector<8x32x32xf32>
    %9 = tpu.matmul %8, %4, %cst_6 {dimension_numbers = #tpu.dot_dimension_numbers<[2], [1], [1], [2], [0, 0, 0, 1, 1, 2], [0], [0]>} : vector<8x32x16xf32>, vector<8x16x32xf32>, vector<8x32x32xf32> -> vector<8x32x32xf32>
    "tpu.trace_stop"() : () -> ()
    %c0_7 = arith.constant 0 : index
    %c0_8 = arith.constant 0 : index
    %c0_9 = arith.constant 0 : index
    %10 = vector.load %arg4[%c0_7, %c0_8, %c0_9] : memref<8x32x32xf32, #tpu.memory_space<vmem>>, vector<8x32x32xf32>
    tpu.vector_store %arg4[%c0_7, %c0_8, %c0_9], %9 {strides = array<i32>} : memref<8x32x32xf32, #tpu.memory_space<vmem>>, vector<8x32x32xf32>,
    return
  }
  func.func @transform_0(%arg0: i32) -> (i32, i32, i32) {
    %c0_i32 = arith.constant 0 : i32
    %c0_i32_0 = arith.constant 0 : i32
    %c0_i32_1 = arith.constant 0 : i32
    return %arg0, %c0_i32, %c0_i32_0 : i32, i32, i32
  }
  func.func @transform_1(%arg0: i32) -> (i32, i32) {
    %c0_i32 = arith.constant 0 : i32
    %c0_i32_0 = arith.constant 0 : i32
    %c0_i32_1 = arith.constant 0 : i32
    return %c0_i32, %c0_i32_0 : i32, i32
  }
  func.func @transform_2(%arg0: i32) -> (i32, i32) {
    %c0_i32 = arith.constant 0 : i32
    %c0_i32_0 = arith.constant 0 : i32
    %c0_i32_1 = arith.constant 0 : i32
    return %c0_i32, %c0_i32_0 : i32, i32
  }
  func.func @transform_3(%arg0: i32) -> (i32, i32, i32) {
    %c0_i32 = arith.constant 0 : i32
    %c0_i32_0 = arith.constant 0 : i32
    %c0_i32_1 = arith.constant 0 : i32
    return %arg0, %c0_i32, %c0_i32_0 : i32, i32, i32
  }
}

</mosaic_0001>

<bundles_post_ra>
// kernel: tpu_custom_call.1
= control target key start
LH: loop header
LB: loop body
LE: loop exit
PB: predicated region body
PF: predicated region fallthrough
CT: control target
= control target key end

     0   :  { %8 = vsyncpa [#allocation3], 0  ;;  %s1431_s0 = inlined_call_operand.hbm [shape: f32[8,16,16], index: 0, kind: input, shape index: {}]   ;;  %s1432_s1 = inlined_call_operand.vmem [shape: f32[16,32], index: 1, kind: input, shape index: {}]   ;;  %s1433_s2 = inlined_call_operand.vmem [shape: f32[32,16], index: 2, kind: input, shape index: {}]   ;;  %s1434_s3 = inlined_call_operand.hbm [shape: f32[8,32,32], index: 3, kind: output, shape index: {}]  }
   0x1   :  { %9 = vsyncpa [#allocation4], 0  ;;  %s1257_s12 = smov [#allocation2]  }
   0x2   :  { %s15_s13 = sshll.u32 %s1257_s12, 4  ;;  %s16_s13 = int_to_ptr.vmem [resolvable:$true] %s15_s13 }
   0x3   :  { %s1221_s14 = scalar_lea.vmem %s16_s13, 2048  ;;  %p1226_p1 = scmp.lt.s32.totalorder %s16_s13, %s16_s13 }
   0x4   :  { %p1222_p0 = scmp.ne.s32.totalorder %s16_s13, %s1221_s14  ;;  %p1227_p2 = scmp.lt.s32.totalorder %s1221_s14, %s1221_s14 }
   0x6   :  { %p1228_p3 = por %p1227_p2, %p1226_p1 }
   0x8   :  { %p1229_p4 = pnand %p1228_p3, %p1222_p0 }
   0xa   :  { %1232 = shalt.err (!%p1229_p4)
}
   0xb   :  { %s1258_s15 = smov 128   ;;  %s1259_s16 = smov 8  }
   0xc   :  { %21 = dma.hbm_to_vmem [thread:$0]  %s1431_s0, 2048, %s16_s13, [#allocation3], %s1258_s15, %s1258_s15, %s1259_s16  }
   0xd   :  { %1253 = dma.done.wait [#allocation3], 2048  }
   0xe   :  { %1254 = vsyncadd [#allocation3], 4294965248  ;;  %vm47_vm0 = vcmask 130048   ;;  %v46_v0 = vld [vmem:[%s1432_s1 + $0x8] sm:$0xff]  ;;  %v45_v1 = vld [vmem:[%s1432_s1] sm:$0xff]  ;;  %vm937_vm1 = vcmask 261120  }
   0xf   :  { %v29_v2 = vld [vmem:[#allocation2] sm:$0xff]  ;;  %1101 = vmatprep.subr.mxu0 %v46_v0  ;;  %v30_v3 = vld [vmem:[#allocation2 + $0x8] sm:$0xff]  ;;  %v31_v4 = vld [vmem:[#allocation2 + $0x10] sm:$0xff] }
  0x10   :  { %1105 = vmatprep.mubr.msk.f32.mxu0 %vm47_vm0, %v29_v2  ;;  %1102 = vmatpush3.msra.mxu0 %v46_v0  ;;  %v32_v5 = vld [vmem:[#allocation2 + $0x18] sm:$0xff]  ;;  %v33_v6 = vld [vmem:[#allocation2 + $0x20] sm:$0xff]  ;;  %v34_v7 = vld [vmem:[#allocation2 + $0x28] sm:$0xff] }
  0x11   :  { %1103 = vmatprep.subr.mxu0 %v45_v1  ;;  %v35_v8 = vld [vmem:[#allocation2 + $0x30] sm:$0xff]  ;;  %v36_v9 = vld [vmem:[#allocation2 + $0x38] sm:$0xff]  ;;  %v37_v10 = vld [vmem:[#allocation2 + $0x40] sm:$0xff] }
  0x12   :  { %1104 = vmatpush3.msra.mxu0 %v45_v1  ;;  %v38_v11 = vld [vmem:[#allocation2 + $0x48] sm:$0xff]  ;;  %v39_v12 = vld [vmem:[#allocation2 + $0x50] sm:$0xff]  ;;  %v40_v13 = vld [vmem:[#allocation2 + $0x58] sm:$0xff] }
  0x13   :  { %1106 = vmatmul.mubr.msk.f32.vlgmr.msra.gmra.mxu0 %vm47_vm0, %v30_v3  ;;  %v41_v14 = vld [vmem:[#allocation2 + $0x60] sm:$0xff]  ;;  %v42_v15 = vld [vmem:[#allocation2 + $0x68] sm:$0xff]  ;;  %v43_v16 = vld [vmem:[#allocation2 + $0x70] sm:$0xff] }
  0x14   :  { %1108 = vmatprep.mubr.msk.f32.mxu0 %vm47_vm0, %v31_v4  ;;  %v44_v17 = vld [vmem:[#allocation2 + $0x78] sm:$0xff]  ;;  %v1312_v18 = vld [vmem:[%s1433_s2] sm:$0xff]  ;;  %v1321_v21 = vld [vmem:[%s1433_s2 + $0x8] sm:$0xff] }
  0x15   :  { %1133 = vmatprep.mubr.msk.f32.mxu1 %vm47_vm0, %v1312_v18  ;;  %v1326_v22 = vld [vmem:[%s1433_s2 + $0x10] sm:$0xff]  ;;  %v1335_v25 = vld [vmem:[%s1433_s2 + $0x18] sm:$0xff]  ;;  %s1260_s2 = smov [#allocation5]  }
  0x16   :  { %s975_s29 = sshll.u32 %s1260_s2, 4  ;;  %s976_s29 = int_to_ptr.vmem [resolvable:$true] %s975_s29 }
  0x17   :  { %1109 = vmatmul.mubr.msk.f32.gmra.mxu0 %vm47_vm0, %v32_v5  ;;  %s1233_s30 = scalar_lea.vmem %s976_s29, 4096  ;;  %p1238_p6 = scmp.lt.s32.totalorder %s976_s29, %s976_s29 }
  0x18   :  { %1111 = vmatprep.mubr.msk.f32.mxu0 %vm47_vm0, %v33_v6  ;;  %p1234_p5 = scmp.ne.s32.totalorder %s976_s29, %s1233_s30  ;;  %p1239_p7 = scmp.lt.s32.totalorder %s1233_s30, %s1233_s30 }
  0x1a   :  { %p1240_p8 = por %p1239_p7, %p1238_p6 }
  0x1b   :  { %1112 = vmatmul.mubr.msk.f32.gmra.mxu0 %vm47_vm0, %v34_v7 }
  0x1c   :  { %1114 = vmatprep.mubr.msk.f32.mxu0 %vm47_vm0, %v35_v8  ;;  %p1241_p9 = pnand %p1240_p8, %p1234_p5 }
  0x1f   :  { %1115 = vmatmul.mubr.msk.f32.gmra.mxu0 %vm47_vm0, %v36_v9 }
  0x20   :  { %1117 = vmatprep.mubr.msk.f32.mxu0 %vm47_vm0, %v37_v10 }
  0x23   :  { %1118 = vmatmul.mubr.msk.f32.gmra.mxu0 %vm47_vm0, %v38_v11 }
  0x24   :  { %1120 = vmatprep.mubr.msk.f32.mxu0 %vm47_vm0, %v39_v12 }
  0x27   :  { %1121 = vmatmul.mubr.msk.f32.gmra.mxu0 %vm47_vm0, %v40_v13 }
  0x28   :  { %1123 = vmatprep.mubr.msk.f32.mxu0 %vm47_vm0, %v41_v14 }
  0x2b   :  { %1124 = vmatmul.mubr.msk.f32.gmra.mxu0 %vm47_vm0, %v42_v15 }
  0x2c   :  { %1126 = vmatprep.mubr.msk.f32.mxu0 %vm47_vm0, %v43_v16 }
  0x2f   :  { %1127 = vmatmul.mubr.msk.f32.gmra.mxu0 %vm47_vm0, %v44_v17 }
  0x30   :  { %1173 = vmatprep.mubr.msk.f32.mxu0 %vm47_vm0, %v1312_v18 }
  0xd3   :  { %v1107_v19 = vpop.f32.mrf.mxu0 }
  0xd4   :  { %1129 = vmatprep.subr.mxu1 %v1107_v19 }
  0xd5   :  { %v162_v20 = vpop.f32.mrf.mxu0  ;;  %1130 = vmatpush3.msra.mxu1 %v1107_v19 }
  0xd6   :  { %1131 = vmatprep.subr.mxu1 %v162_v20 }
  0xd7   :  { %v1110_v23 = vpop.f32.mrf.mxu0  ;;  %1132 = vmatpush3.msra.mxu1 %v162_v20 }
  0xd8   :  { %1134 = vmatmul.mubr.msk.f32.vlgmr.msra.gmra.mxu1 %vm47_vm0, %v1321_v21  ;;  %1139 = vmatprep.subr.mxu1 %v1110_v23 }
  0xd9   :  { %v172_v24 = vpop.f32.mrf.mxu0  ;;  %1140 = vmatpush3.msra.mxu1 %v1110_v23  ;;  %1136 = vmatprep.mubr.msk.f32.mxu1 %vm47_vm0, %v1326_v22 }
  0xda   :  { %1141 = vmatprep.subr.mxu1 %v172_v24 }
  0xdb   :  { %v1113_v26 = vpop.f32.mrf.mxu0  ;;  %1142 = vmatpush3.msra.mxu1 %v172_v24 }
  0xdc   :  { %1137 = vmatmul.mubr.msk.f32.gmra.mxu1 %vm47_vm0, %v1335_v25  ;;  %1149 = vmatprep.subr.mxu1 %v1113_v26 }
  0xdd   :  { %v182_v27 = vpop.f32.mrf.mxu0  ;;  %1143 = vmatprep.mubr.msk.f32.mxu1 %vm47_vm0, %v1312_v18 }
  0xdf   :  { %v1116_v28 = vpop.f32.mrf.mxu0 }
  0xe0   :  { %1144 = vmatmul.mubr.msk.f32.vlgmr.msra.gmra.mxu1 %vm47_vm0, %v1321_v21 }
  0xe1   :  { %1150 = vmatpush3.msra.mxu1 %v1113_v26  ;;  %v192_v29 = vpop.f32.mrf.mxu0  ;;  %1146 = vmatprep.mubr.msk.f32.mxu1 %vm47_vm0, %v1326_v22 }
  0xe2   :  { %1151 = vmatprep.subr.mxu1 %v182_v27 }
  0xe3   :  { %1152 = vmatpush3.msra.mxu1 %v182_v27  ;;  %v1119_v30 = vpop.f32.mrf.mxu0 }
  0xe4   :  { %1159 = vmatprep.subr.mxu1 %v1116_v28  ;;  %1147 = vmatmul.mubr.msk.f32.gmra.mxu1 %vm47_vm0, %v1335_v25 }
  0xe5   :  { %1169 = vmatprep.subr.mxu0 %v1119_v30  ;;  %v202_v31 = vpop.f32.mrf.mxu0  ;;  %1153 = vmatprep.mubr.msk.f32.mxu1 %vm47_vm0, %v1312_v18 }
  0xe6   :  { %1170 = vmatpush3.msra.mxu0 %v1119_v30 }
  0xe7   :  { %1171 = vmatprep.subr.mxu0 %v202_v31  ;;  %v1122_v32 = vpop.f32.mrf.mxu0 }
  0xe8   :  { %1172 = vmatpush3.msra.mxu0 %v202_v31  ;;  %1154 = vmatmul.mubr.msk.f32.vlgmr.msra.gmra.mxu1 %vm47_vm0, %v1321_v21 }
  0xe9   :  { %1160 = vmatpush3.msra.mxu1 %v1116_v28  ;;  %1156 = vmatprep.mubr.msk.f32.mxu1 %vm47_vm0, %v1326_v22  ;;  %v212_v33 = vpop.f32.mrf.mxu0 }
  0xea   :  { %1161 = vmatprep.subr.mxu1 %v192_v29  ;;  %1174 = vmatmul.mubr.msk.f32.vlgmr.msra.gmra.mxu0 %vm47_vm0, %v1321_v21 }
  0xeb   :  { %1162 = vmatpush3.msra.mxu1 %v192_v29  ;;  %v1125_v34 = vpop.f32.mrf.mxu0  ;;  %1176 = vmatprep.mubr.msk.f32.mxu0 %vm47_vm0, %v1326_v22 }
  0xec   :  { %1157 = vmatmul.mubr.msk.f32.gmra.mxu1 %vm47_vm0, %v1335_v25  ;;  %1179 = vmatprep.subr.mxu1 %v1122_v32 }
  0xed   :  { %1163 = vmatprep.mubr.msk.f32.mxu1 %vm47_vm0, %v1312_v18  ;;  %1189 = vmatprep.subr.mxu0 %v1125_v34  ;;  %v222_v35 = vpop.f32.mrf.mxu0 }
  0xee   :  { %1190 = vmatpush3.msra.mxu0 %v1125_v34 }
  0xef   :  { %1191 = vmatprep.subr.mxu0 %v222_v35  ;;  %1177 = vmatmul.mubr.msk.f32.gmra.mxu0 %vm47_vm0, %v1335_v25  ;;  %v1128_v36 = vpop.f32.mrf.mxu0 }
  0xf0   :  { %1164 = vmatmul.mubr.msk.f32.vlgmr.msra.gmra.mxu1 %vm47_vm0, %v1321_v21  ;;  %1192 = vmatpush3.msra.mxu0 %v222_v35 }
  0xf1   :  { %1180 = vmatpush3.msra.mxu1 %v1122_v32  ;;  %1166 = vmatprep.mubr.msk.f32.mxu1 %vm47_vm0, %v1326_v22  ;;  %v232_v37 = vpop.f32.mrf.mxu0 }
  0xf2   :  { %1181 = vmatprep.subr.mxu1 %v212_v33  ;;  %1193 = vmatprep.mubr.msk.f32.mxu0 %vm47_vm0, %v1312_v18 }
  0xf3   :  { %1182 = vmatpush3.msra.mxu1 %v212_v33  ;;  %1194 = vmatmul.mubr.msk.f32.vlgmr.msra.gmra.mxu0 %vm47_vm0, %v1321_v21 }
  0xf4   :  { %1167 = vmatmul.mubr.msk.f32.gmra.mxu1 %vm47_vm0, %v1335_v25  ;;  %1199 = vmatprep.subr.mxu1 %v1128_v36 }
  0xf5   :  { %1183 = vmatprep.mubr.msk.f32.mxu1 %vm47_vm0, %v1312_v18  ;;  %1196 = vmatprep.mubr.msk.f32.mxu0 %vm47_vm0, %v1326_v22 }
  0xf7   :  { %1197 = vmatmul.mubr.msk.f32.gmra.mxu0 %vm47_vm0, %v1335_v25 }
  0xf8   :  { %1184 = vmatmul.mubr.msk.f32.vlgmr.msra.gmra.mxu1 %vm47_vm0, %v1321_v21 }
  0xf9   :  { %1200 = vmatpush3.msra.mxu1 %v1128_v36  ;;  %1186 = vmatprep.mubr.msk.f32.mxu1 %vm47_vm0, %v1326_v22 }
  0xfa   :  { %1201 = vmatprep.subr.mxu1 %v232_v37 }
  0xfb   :  { %1202 = vmatpush3.msra.mxu1 %v232_v37 }
  0xfc   :  { %1187 = vmatmul.mubr.msk.f32.gmra.mxu1 %vm47_vm0, %v1335_v25 }
  0xfd   :  { %1203 = vmatprep.mubr.msk.f32.mxu1 %vm47_vm0, %v1312_v18 }
 0x100   :  { %1204 = vmatmul.mubr.msk.f32.vlgmr.msra.gmra.mxu1 %vm47_vm0, %v1321_v21 }
 0x101   :  { %1206 = vmatprep.mubr.msk.f32.mxu1 %vm47_vm0, %v1326_v22 }
 0x104   :  { %1207 = vmatmul.mubr.msk.f32.gmra.mxu1 %vm47_vm0, %v1335_v25 }
 0x198   :  { %v1135_v38 = vpop.f32.mrf.mxu1 }
 0x199   :  { %939 = vst.msk [vmem:[#allocation5 + $0x8] sm:$0xff] %vm937_vm1, %v1135_v38 }
 0x19a   :  { %v323_v39 = vpop.f32.mrf.mxu1 }
 0x19b   :  { %938 = vst.msk [vmem:[#allocation5] sm:$0xff] %vm937_vm1, %v323_v39 }
 0x19c   :  { %v1138_v40 = vpop.f32.mrf.mxu1 }
 0x19d   :  { %941 = vst.msk [vmem:[#allocation5 + $0x18] sm:$0xff] %vm937_vm1, %v1138_v40 }
 0x19e   :  { %v333_v41 = vpop.f32.mrf.mxu1 }
 0x19f   :  { %940 = vst.msk [vmem:[#allocation5 + $0x10] sm:$0xff] %vm937_vm1, %v333_v41 }
 0x1a0   :  { %v1145_v42 = vpop.f32.mrf.mxu1 }
 0x1a1   :  { %943 = vst.msk [vmem:[#allocation5 + $0x28] sm:$0xff] %vm937_vm1, %v1145_v42 }
 0x1a2   :  { %v408_v43 = vpop.f32.mrf.mxu1 }
 0x1a3   :  { %942 = vst.msk [vmem:[#allocation5 + $0x20] sm:$0xff] %vm937_vm1, %v408_v43 }
 0x1a4   :  { %v1148_v44 = vpop.f32.mrf.mxu1 }
 0x1a5   :  { %945 = vst.msk [vmem:[#allocation5 + $0x38] sm:$0xff] %vm937_vm1, %v1148_v44 }
 0x1a6   :  { %v418_v45 = vpop.f32.mrf.mxu1 }
 0x1a7   :  { %944 = vst.msk [vmem:[#allocation5 + $0x30] sm:$0xff] %vm937_vm1, %v418_v45 }
 0x1a8   :  { %v1155_v46 = vpop.f32.mrf.mxu1 }
 0x1a9   :  { %947 = vst.msk [vmem:[#allocation5 + $0x48] sm:$0xff] %vm937_vm1, %v1155_v46 }
 0x1aa   :  { %v493_v47 = vpop.f32.mrf.mxu1  ;;  %v1175_v48 = vpop.f32.mrf.mxu0 }
 0x1ab   :  { %946 = vst.msk [vmem:[#allocation5 + $0x40] sm:$0xff] %vm937_vm1, %v493_v47  ;;  %955 = vst.msk [vmem:[#allocation5 + $0x88] sm:$0xff] %vm937_vm1, %v1175_v48 }
 0x1ac   :  { %v1158_v49 = vpop.f32.mrf.mxu1  ;;  %v663_v50 = vpop.f32.mrf.mxu0 }
 0x1ad   :  { %949 = vst.msk [vmem:[#allocation5 + $0x58] sm:$0xff] %vm937_vm1, %v1158_v49  ;;  %954 = vst.msk [vmem:[#allocation5 + $0x80] sm:$0xff] %vm937_vm1, %v663_v50 }
 0x1ae   :  { %v503_v51 = vpop.f32.mrf.mxu1 }
 0x1af   :  { %948 = vst.msk [vmem:[#allocation5 + $0x50] sm:$0xff] %vm937_vm1, %v503_v51  ;;  %v1178_v52 = vpop.f32.mrf.mxu0 }
 0x1b0   :  { %v1165_v53 = vpop.f32.mrf.mxu1  ;;  %957 = vst.msk [vmem:[#allocation5 + $0x98] sm:$0xff] %vm937_vm1, %v1178_v52 }
 0x1b1   :  { %951 = vst.msk [vmem:[#allocation5 + $0x68] sm:$0xff] %vm937_vm1, %v1165_v53  ;;  %v673_v54 = vpop.f32.mrf.mxu0 }
 0x1b2   :  { %v578_v55 = vpop.f32.mrf.mxu1  ;;  %956 = vst.msk [vmem:[#allocation5 + $0x90] sm:$0xff] %vm937_vm1, %v673_v54 }
 0x1b3   :  { %950 = vst.msk [vmem:[#allocation5 + $0x60] sm:$0xff] %vm937_vm1, %v578_v55  ;;  %v1195_v56 = vpop.f32.mrf.mxu0 }
 0x1b4   :  { %v1168_v57 = vpop.f32.mrf.mxu1  ;;  %963 = vst.msk [vmem:[#allocation5 + $0xc8] sm:$0xff] %vm937_vm1, %v1195_v56 }
 0x1b5   :  { %953 = vst.msk [vmem:[#allocation5 + $0x78] sm:$0xff] %vm937_vm1, %v1168_v57  ;;  %v833_v58 = vpop.f32.mrf.mxu0 }
 0x1b6   :  { %v588_v59 = vpop.f32.mrf.mxu1  ;;  %962 = vst.msk [vmem:[#allocation5 + $0xc0] sm:$0xff] %vm937_vm1, %v833_v58 }
 0x1b7   :  { %952 = vst.msk [vmem:[#allocation5 + $0x70] sm:$0xff] %vm937_vm1, %v588_v59  ;;  %v1198_v60 = vpop.f32.mrf.mxu0 }
 0x1b8   :  { %v1185_v61 = vpop.f32.mrf.mxu1  ;;  %965 = vst.msk [vmem:[#allocation5 + $0xd8] sm:$0xff] %vm937_vm1, %v1198_v60 }
 0x1b9   :  { %959 = vst.msk [vmem:[#allocation5 + $0xa8] sm:$0xff] %vm937_vm1, %v1185_v61  ;;  %v843_v62 = vpop.f32.mrf.mxu0 }
 0x1ba   :  { %v748_v63 = vpop.f32.mrf.mxu1  ;;  %964 = vst.msk [vmem:[#allocation5 + $0xd0] sm:$0xff] %vm937_vm1, %v843_v62 }
 0x1bb   :  { %958 = vst.msk [vmem:[#allocation5 + $0xa0] sm:$0xff] %vm937_vm1, %v748_v63 }
 0x1bc   :  { %v1188_v0 = vpop.f32.mrf.mxu1 }
 0x1bd   :  { %961 = vst.msk [vmem:[#allocation5 + $0xb8] sm:$0xff] %vm937_vm1, %v1188_v0 }
 0x1be   :  { %v758_v1 = vpop.f32.mrf.mxu1 }
 0x1bf   :  { %960 = vst.msk [vmem:[#allocation5 + $0xb0] sm:$0xff] %vm937_vm1, %v758_v1 }
 0x1c0   :  { %v1205_v2 = vpop.f32.mrf.mxu1 }
 0x1c1   :  { %967 = vst.msk [vmem:[#allocation5 + $0xe8] sm:$0xff] %vm937_vm1, %v1205_v2 }
 0x1c2   :  { %v918_v3 = vpop.f32.mrf.mxu1 }
 0x1c3   :  { %966 = vst.msk [vmem:[#allocation5 + $0xe0] sm:$0xff] %vm937_vm1, %v918_v3 }
 0x1c4   :  { %v1208_v4 = vpop.f32.mrf.mxu1 }
 0x1c5   :  { %969 = vst.msk [vmem:[#allocation5 + $0xf8] sm:$0xff] %vm937_vm1, %v1208_v4 }
 0x1c6   :  { %v928_v5 = vpop.f32.mrf.mxu1 }
 0x1c7   :  { %968 = vst.msk [vmem:[#allocation5 + $0xf0] sm:$0xff] %vm937_vm1, %v928_v5 }
 0x1c8   :  { %1244 = shalt.err (!%p1241_p9)
}
 0x1c9   :  { %981 = dma.vmem_to_hbm [thread:$0]  %s976_s29, 4096, %s1434_s3, [#allocation4], %s1258_s15, %s1258_s15, %s1259_s16  }
 0x1ca   :  { %1255 = dma.done.wait [#allocation4], 4096  }
 0x1cb   :  { %1256 = vsyncadd [#allocation4], 4294963200 }
 0x1cc   :  { %985 = vsyncpa [#allocation3], 1 }
 0x1cd   :  { %986 = vsyncpa [#allocation4], 1 }

</bundles_post_ra>
